<compile_context>
chip_gen: v5e
topology: v5e:2x2
jax: 0.10.0
libtpu: 0.0.40
codegen_flags: <defaults>
</compile_context>

<pallas_src>
import functools

import jax
import jax.numpy as jnp
import numpy as np
from jax.experimental import pallas as pl
from jax.experimental.pallas import tpu as pltpu

LANE = 128
SUBLANE = 8
V5E_SCOPED_VMEM_DEFAULT = 16 << 20  # smallest default scoped-VMEM of v5e/v6e/v7x


def _round_up(x: int, m: int) -> int:
    return (x + m - 1) // m * m


# ----------------------------------------------------------------------------
# Pallas kernel: padded one-hot scatter over a tile of rows.
#   ids_ref : (TR, 1)      int32   phoneme index per row, -1 => zero row
#   out_ref : (TR, P_pad)  one-hot rows (P_pad is a multiple of 128 -> lane-dense)
# ----------------------------------------------------------------------------
def _one_hot_kernel(ids_ref, out_ref):
    ids = ids_ref[...]                                              # (TR, 1) int32
    cols = jax.lax.broadcasted_iota(jnp.int32, out_ref.shape, 1)    # (TR, P_pad)
    out_ref[...] = (ids == cols).astype(out_ref.dtype)


def _pick_row_tile(n_rows: int, row_tile: int) -> int:
    """Tile = multiple of 8 sublanes, <= row_tile, and small enough that the
    grid has >= 2 steps when n_rows allows it (keeps both v7x TCs busy)."""
    row_tile = max(SUBLANE, (row_tile // SUBLANE) * SUBLANE)
    r8 = _round_up(n_rows, SUBLANE)
    half = _round_up((r8 + 1) // 2, SUBLANE)
    return max(SUBLANE, min(row_tile, half))


@functools.partial(jax.jit, static_argnames=("phone_pad", "dtype", "row_tile"))
def _one_hot_rows(ids_rows: jax.Array, *, phone_pad: int,
                  dtype=jnp.float32, row_tile: int = 2048) -> jax.Array:
    """ids_rows: (R,) int32 -> (R_pad, phone_pad) one-hot; id == -1 -> zero row."""
    ids_rows = ids_rows.reshape(-1, 1).astype(jnp.int32)
    R = ids_rows.shape[0]
    TR = _pick_row_tile(R, row_tile)
    R_pad = _round_up(R, TR)
    if R_pad != R:
        ids_rows = jnp.pad(ids_rows, ((0, R_pad - R), (0, 0)), constant_values=-1)

    itemsize = jnp.dtype(dtype).itemsize
    # Double-buffered blocks: output (TR, phone_pad) + ids lane-padded to
    # (TR, 128) int32 (as big as an f32 output block).  + 1 MiB slack.
    vmem_needed = 2 * (TR * phone_pad * itemsize + TR * LANE * 4) + (1 << 20)
    cp_kwargs = dict(dimension_semantics=("parallel",))
    if vmem_needed > V5E_SCOPED_VMEM_DEFAULT:
        cp_kwargs["vmem_limit_bytes"] = int(vmem_needed)

    return pl.pallas_call(
        _one_hot_kernel,
        out_shape=jax.ShapeDtypeStruct((R_pad, phone_pad), dtype),
        grid=(R_pad // TR,),
        in_specs=[pl.BlockSpec((TR, 1), lambda i: (i, 0))],
        out_specs=pl.BlockSpec((TR, phone_pad), lambda i: (i, 0)),
        compiler_params=pltpu.CompilerParams(**cp_kwargs),
    )(ids_rows)


# ----------------------------------------------------------------------------
# Word2Phone module (JAX / Pallas version).
# The lexicon is passed as lines ("WORD PH1 PH2 ...") so the script is
# self-contained (stands in for reading lexicon_path).
# ----------------------------------------------------------------------------
class Word2Phone:
    def __init__(self, lexicon_lines, fixed_len=-1, dtype=jnp.float32):
        # Mirror the PyTorch __init__: collect phoneme vocab, sort it, and
        # store per-word phoneme index sequences.
        phonemes = {}
        for line in lexicon_lines:
            lexicon = line.split()
            for phone in lexicon[1:]:
                phonemes[phone] = phonemes.get(phone, 0) + 1
        all_phonemes = sorted(phonemes.keys())
        self.phone_num = len(all_phonemes)
        self.phone_pad = max(LANE, _round_up(self.phone_num, LANE))  # lane-dense
        phone_to_idx = {p: i for i, p in enumerate(all_phonemes)}

        # Keys kept verbatim while queries are .upper()-ed -- exactly like the
        # PyTorch module (a lowercase lexicon entry is unreachable there too).
        word_phone_ids = {}
        for line in lexicon_lines:
            lexicon = line.split()
            word_phone_ids[lexicon[0]] = [phone_to_idx[p] for p in lexicon[1:]]
        self.word_phone_ids = word_phone_ids
        self.fixed_len = fixed_len
        self.oov_len = 3  # OOV -> zeros((3, phone_num)) as in the PyTorch fallback
        self.dtype = dtype

        max_len = max(len(v) for v in word_phone_ids.values())
        if fixed_len > 0:
            if max_len > fixed_len:
                raise ValueError(
                    f"word with {max_len} phonemes exceeds fixed_len={fixed_len} "
                    "(the PyTorch reference would fail on the negative-size pad)")
            self.row_len = fixed_len
        else:
            # Fixed row bucket for a stable shape; per-word true length is
            # recovered by slicing (padding rows are exact zeros anyway).
            self.row_len = max(max_len, self.oov_len)

        # Lexicon id table: one row bucket per word, last bucket = OOV (all -1).
        num_words = len(word_phone_ids)
        self.word_to_row = {w: i for i, w in enumerate(word_phone_ids)}
        self.oov_row = num_words
        ids = np.full((num_words + 1, self.row_len), -1, dtype=np.int32)
        for w, pids in word_phone_ids.items():
            ids[self.word_to_row[w], : len(pids)] = pids

        # ONE pallas_call over the whole lexicon: precompute the padded one-hot
        # table once.  forward()/forward_batch() never launch a kernel again.
        n_rows = (num_words + 1) * self.row_len
        onehot = _one_hot_rows(jnp.asarray(ids.reshape(-1)),
                               phone_pad=self.phone_pad, dtype=dtype)
        # One-time (init-only) trim + reshape into (words, row_len, phone_pad).
        self.onehot_table = onehot[:n_rows].reshape(
            num_words + 1, self.row_len, self.phone_pad)

    # -- helpers -------------------------------------------------------------
    def _row_and_len(self, word: str):
        word = word.upper()
        row = self.word_to_row.get(word, self.oov_row)
        n = self.oov_len if row == self.oov_row else len(self.word_phone_ids[word])
        return row, n

    # -- single-word forward (matches the PyTorch module exactly) -------------
    def forward(self, word: str) -> jax.Array:
        # Pure device slice of the precomputed table -- no kernel launch.
        row, n = self._row_and_len(word)
        out_len = self.fixed_len if self.fixed_len > 0 else n
        return self.onehot_table[row, :out_len, : self.phone_num]

    __call__ = forward

    # -- batched forward: one device gather for all words ----------------------
    def forward_batch(self, words, return_padded=False):
        """return_padded=True keeps the (provably zero) lane padding:
        (B, row_len, phone_pad) is handed straight to consumers (a matmul with
        a zero-padded weight is bit-identical) and skips an extra HBM pass."""
        rows_lens = [self._row_and_len(w) for w in words]
        rows = jnp.asarray([r for r, _ in rows_lens], dtype=jnp.int32)
        batch = jnp.take(self.onehot_table, rows, axis=0)     # (B, row_len, P_pad)
        if return_padded:
            return batch
        batch = batch[:, :, : self.phone_num]
        if self.fixed_len > 0:
            return batch                                      # (B, fixed_len, P)
        # Variable-length mode: per-word true-length views (matches PyTorch
        # per-word return shapes; issues one tiny slice per word).
        return [batch[i, :n] for i, (_, n) in enumerate(rows_lens)]


# ----------------------------------------------------------------------------
# Reference (numpy) implementation of the PyTorch forward, for verification.
# ----------------------------------------------------------------------------
def reference_forward(module: Word2Phone, word: str) -> np.ndarray:
    word = word.upper()
    ids = module.word_phone_ids.get(word, None)
    if ids is None:
        phoneme = np.zeros((3, module.phone_num), dtype=np.float32)
    else:
        phoneme = np.zeros((len(ids), module.phone_num), dtype=np.float32)
        for i, p in enumerate(ids):
            phoneme[i, p] = 1.0
    if module.fixed_len > 0:
        pad = np.zeros((module.fixed_len - phoneme.shape[0], module.phone_num),
                       dtype=np.float32)
        phoneme = np.concatenate([phoneme, pad], axis=0)
    return phoneme


if __name__ == "__main__":
    # Deterministic synthetic lexicon (stands in for the lexicon file).
    lexicon_lines = [
        "HELLO HH AH L OW",
        "WORLD W ER L D",
        "CAT K AE T",
        "DOG D AO G",
        "PHONE F OW N",
        "KERNEL K ER N AH L",
        "JAX JH AE K S",
        "TPU T IY P IY Y UW",
    ]
    fixed_len = 8
    module = Word2Phone(lexicon_lines, fixed_len=fixed_len)
    jax.block_until_ready(module.onehot_table)   # the single pallas_call ran here

    # PRNGKey used deterministically to pick the word order.
    key = jax.random.PRNGKey(0)
    base_words = ["hello", "kernel", "tpu", "unknownword",
                  "cat", "world", "dog", "jax"]
    perm = np.asarray(jax.random.permutation(key, len(base_words)))
    words = [base_words[int(i)] for i in perm]

    ok = True

    # 1) Batched path: single device gather from the precomputed table.
    batch = jax.block_until_ready(module.forward_batch(words))
    assert batch.shape == (len(words), fixed_len, module.phone_num), batch.shape
    for i, w in enumerate(words):
        ref = reference_forward(module, w)
        if not np.allclose(np.asarray(batch[i]), ref):
            ok = False
            print(f"BATCH MISMATCH for word {w!r}")

    # 1b) Padded batched path: extra lanes must be exactly zero.
    batch_pad = jax.block_until_ready(module.forward_batch(words, return_padded=True))
    assert batch_pad.shape == (len(words), module.row_len, module.phone_pad)
    if not np.allclose(np.asarray(batch_pad[:, :, module.phone_num:]), 0.0):
        ok = False
        print("PADDED LANES NOT ZERO")
    if not np.allclose(np.asarray(batch_pad[:, :, : module.phone_num]),
                       np.asarray(batch)):
        ok = False
        print("PADDED/NARROW MISMATCH")

    # 2) Single-word path (including OOV fallback), no kernel launch per call.
    for w in words[:3] + ["unknownword"]:
        out = jax.block_until_ready(module(w))
        ref = reference_forward(module, w)
        if out.shape != ref.shape or not np.allclose(np.asarray(out), ref):
            ok = False
            print(f"MISMATCH for word {w!r}: {out.shape} vs {ref.shape}")

    # 3) Variable-length mode (fixed_len = -1): shapes follow the word length.
    module_var = Word2Phone(lexicon_lines, fixed_len=-1)
    for w in ["hello", "cat", "tpu", "unknownword"]:
        out = jax.block_until_ready(module_var(w))
        ref = reference_forward(module_var, w)
        if out.shape != ref.shape or not np.allclose(np.asarray(out), ref):
            ok = False
            print(f"VARLEN MISMATCH for word {w!r}: {out.shape} vs {ref.shape}")

    # 4) bf16 table (halved HBM writeback) -- 0/1 values are exact in bf16.
    module_bf16 = Word2Phone(lexicon_lines, fixed_len=fixed_len, dtype=jnp.bfloat16)
    out_bf16 = jax.block_until_ready(module_bf16("hello"))
    if not np.allclose(np.asarray(out_bf16, dtype=np.float32),
                       reference_forward(module_bf16, "hello")):
        ok = False
        print("BF16 MISMATCH for word 'hello'")

    if ok:
        print("KERNEL_OK")
</pallas_src>

<mosaic_0001>
module attributes {stable_mosaic.version = 11 : i64} {
  func.func @_one_hot_kernel(%arg0: i32, %arg1: memref<40x1xi32, #tpu.memory_space<vmem>>, %arg2: memref<40x128xf32, #tpu.memory_space<vmem>>) attributes {dimension_semantics = [#tpu.dimension_semantics<parallel>], iteration_bounds = array<i64: 2>, scalar_prefetch = 0 : i64, scratch_operands = 0 : i64, tpu.core_type = #tpu.core_type<tc>, window_params = [{transform_indices = @transform_0, window_bounds = array<i64: 40, 1>}, {transform_indices = @transform_1, window_bounds = array<i64: 40, 128>}]} {
    %c0 = arith.constant 0 : index
    %c0_0 = arith.constant 0 : index
    %0 = vector.load %arg1[%c0, %c0_0] : memref<40x1xi32, #tpu.memory_space<vmem>>, vector<40x1xi32>
    %1 = tpu.iota {dimensions = array<i32: 1>} : vector<40x128xi32>
    %2 = vector.broadcast %0 : vector<40x1xi32> to vector<40x128xi32>
    %3 = arith.cmpi eq, %2, %1 : vector<40x128xi32>
    %4 = arith.extui %3 : vector<40x128xi1> to vector<40x128xi32>
    %5 = arith.sitofp %4 : vector<40x128xi32> to vector<40x128xf32>
    %c0_1 = arith.constant 0 : index
    %c0_2 = arith.constant 0 : index
    %6 = vector.load %arg2[%c0_1, %c0_2] : memref<40x128xf32, #tpu.memory_space<vmem>>, vector<40x128xf32>
    tpu.vector_store %arg2[%c0_1, %c0_2], %5 {strides = array<i32>} : memref<40x128xf32, #tpu.memory_space<vmem>>, vector<40x128xf32>,
    return
  }
  func.func @transform_0(%arg0: i32) -> (i32, i32) {
    %c0_i32 = arith.constant 0 : i32
    %c0_i32_0 = arith.constant 0 : i32
    return %arg0, %c0_i32 : i32, i32
  }
  func.func @transform_1(%arg0: i32) -> (i32, i32) {
    %c0_i32 = arith.constant 0 : i32
    %c0_i32_0 = arith.constant 0 : i32
    return %arg0, %c0_i32 : i32, i32
  }
}

</mosaic_0001>

<bundles_post_ra>
// kernel: _one_hot_rows.1
= control target key start
LH: loop header
LB: loop body
LE: loop exit
PB: predicated region body
PF: predicated region fallthrough
CT: control target
= control target key end

     0   :  { %6 = vsyncpa [#allocation3], 0  ;;  %s465_s0 = inlined_call_operand.vmem [shape: s32[80,1], index: 0, kind: input, shape index: {}]   ;;  %s466_s1 = inlined_call_operand.hbm [shape: f32[80,128], index: 1, kind: output, shape index: {}]  }
   0x1   :  { %8 = vsyncpa [#allocation3 + $0x1], 0  ;;  %s377_s6 = smov 0   ;;  %s379_s7 = smov 0  }
   0x2   :  { %s381_s8 = smov 0   ;;  %s383_s9 = smov 0  }
   0x3 LB: > { %s398_s10 = sadd.s32 4294967295, %s361_s9   ;;  %s238_s11 = sadd.s32 4294967294, %s361_s9   ;;  %s361_s9 = sphi %s383_s9, %s472_s9   ;;  %s357_s8 = sphi %s381_s8, %s471_s8   ;;  %s353_s7 = sphi %s379_s7, %s470_s7   ;;  %s349_s6 = sphi %s377_s6, %s469_s6  }
   0x4   : > { %s402_s12 = sadd.s32 1, %s361_s9   ;;  %s47_s13 = sadd.s32 1, %s357_s8 }
   0x5   : > { %s44_s14 = ssub.s32 %s361_s9, %s402_s12  ;;  %p57_p0 = scmp.ne.s32.totalorder %s357_s8, %s353_s7 }
   0x6   : > { %p45_p1 = scmp.eq.s32.totalorder %s44_s14, 0  ;;  %p58_p2 = scmp.eq.s32.totalorder %s398_s10, 1 }
   0x7   : > { %p63_p3 = scmp.ne.s32.totalorder %s353_s7, %s349_s6  ;;  %p64_p4 = scmp.eq.s32.totalorder %s238_s11, 1 }
   0x8   : > { %s413_s15 = scalar_select %p45_p1, %s357_s8, %s47_s13  }
   0x9   : > { %p415_p5 = por %p58_p2, %p57_p0  ;;  %p419_p6 = por %p64_p4, %p63_p3 }
   0xa   : > { %p241_p7 = scmp.ge.s32.totalorder %s361_s9, 1  ;;  %p91_p8 = scmp.lt.s32.totalorder %s361_s9, 3 }
   0xc   : > { %p92_p9 = pnand %p241_p7, %p91_p8 }
   0xd   : > { %s111_s18 = smul.u32 (!%p92_p9), 5, %s398_s10  ;;  %s108_s23 = sand.u32 (!%p92_p9), 1, %s353_s7  }
   0xe   : > { %95 = sbr.rel (%p92_p9) target bundleno = 153 (0x99), region = 24  ;;  %s161_s3 = scalar_lea.sflag (!%p92_p9), [#allocation3], %s108_s23 }
   0xf   : > { %p112_p10 = scmp.lt.s32.totalorder (!%p92_p9), %s111_s18, 9  ;;  %s252_s24 = smul.u32 (!%p92_p9), 40, %s108_s23 }
  0x10   : > { %s251_s26 = smul.u32 (!%p92_p9), 40, %s398_s10  ;;  %s319_s13 = scalar_lea.hbm (!%p92_p9), %s466_s1, 80 }
  0x11   : > { %s110_s25 = scalar_lea.vmem (!%p92_p9), [#allocation2], %s252_s24 }
  0x12   : > { %s172_s29 = scalar_lea.hbm (!%p92_p9), %s466_s1, %s251_s26  ;;  %s173_s30 = sshll.u32 (!%p92_p9), %s110_s25, 4  ;;  %s174_s30 = int_to_ptr.vmem [resolvable:$true] %s173_s30 }
  0x13   : > { %v363_v0 = vmov 0   ;;  %s474_s18 = smov (!%p112_p10, %s111_s18), 9  ;;  %v123_v6 = vlaneseq  ;;  %v364_v9 = vmov 0.0   ;;  %s175_s2 = sshll.u32 %s172_s29, 4  ;;  %s176_s2 = int_to_ptr.hbm [resolvable:$true] %s175_s2 }
  0x14   : > { %297 = vset.pattern.permute.xlu1 %v363_v0  ;;  %296 = vset.pattern.permute.xlu0 %v363_v0  ;;  %s242_s19 = sshll.u32 %s474_s18, 3  ;;  %s313_s4 = sshra.s32 %s176_s2, 4  ;;  %s314_s4 = int_to_ptr.hbm [resolvable:$true] %s313_s4 }
  0x15   : > { %298 = vset.pattern.permute.xlu2 %v363_v0  ;;  %s115_s22 = scalar_lea.vmem %s465_s0, %s242_s19  ;;  %v124_v7 = vand.u32 127, %v123_v6  ;;  %s315_s5 = scalar_lea.hbm %s314_s4, 40 }
  0x16   : > { %v120_v1 = vld [vmem:[%s115_s22 + $0x10] sm:$0xff]  ;;  %v118_v2 = vld [vmem:[%s115_s22] sm:$0xff]  ;;  %v121_v4 = vld [vmem:[%s115_s22 + $0x18] sm:$0xff]  ;;  %p316_p11 = scmp.ne.s32.totalorder %s314_s4, %s315_s5  ;;  %p320_p0 = scmp.lt.s32.totalorder %s314_s4, %s466_s1 }
  0x17   : > { %132 = vperm.xlu1 %297, %v120_v1   ;;  %126 = vperm.xlu0 %296, %v118_v2   ;;  %v122_v3 = vld [vmem:[%s115_s22 + $0x20] sm:$0xff]  ;;  %v119_v5 = vld [vmem:[%s115_s22 + $0x8] sm:$0xff]  ;;  %p321_p1 = scmp.lt.s32.totalorder %s319_s13, %s315_s5 }
  0x18   : > { %138 = vperm.xlu2 %298, %v122_v3   ;;  %p317_p12 = pnand %p316_p11, %p415_p5 }
  0x19   : > { %p322_p2 = por %p321_p1, %p320_p0 }
  0x1a   : > { %p318_p13 = pneg %p317_p12 }
  0x1c   : > { %p323_p3 = pnand %p322_p2, %p318_p13 }
  0x1f   : > { %135 = vperm.xlu1 %297, %v121_v4   ;;  %129 = vperm.xlu0 %296, %v119_v5  }
  0x72   : > { %v139_v8 = vpop.permute.xlu2 %138 }
  0x73   : > { %vm144_vm0 = vcmp.eq.s32.totalorder %v139_v8, %v124_v7 }
  0x74   : > { %v247_v10 = vsel %vm144_vm0, 1.0, %v364_v9 }
  0x75   : > { %159 = vst [vmem:[%s110_s25 + $0x20] sm:$0xff] %v247_v10 }
  0x89   : > { %v133_v11 = vpop.permute.xlu1 %132  ;;  %v127_v12 = vpop.permute.xlu0 %126 }
  0x8a   : > { %vm142_vm1 = vcmp.eq.s32.totalorder %v133_v11, %v124_v7  ;;  %vm140_vm2 = vcmp.eq.s32.totalorder %v127_v12, %v124_v7 }
  0x8b   : > { %v245_v13 = vsel %vm142_vm1, 1.0, %v364_v9  ;;  %v243_v14 = vsel %vm140_vm2, 1.0, %v364_v9 }
  0x8c   : > { %157 = vst [vmem:[%s110_s25 + $0x10] sm:$0xff] %v245_v13 }
  0x8d   : > { %155 = vst [vmem:[%s110_s25] sm:$0xff] %v243_v14 }
  0x91   : > { %v136_v15 = vpop.permute.xlu1 %135  ;;  %v130_v16 = vpop.permute.xlu0 %129 }
  0x92   : > { %vm143_vm3 = vcmp.eq.s32.totalorder %v136_v15, %v124_v7  ;;  %vm141_vm4 = vcmp.eq.s32.totalorder %v130_v16, %v124_v7 }
  0x93   : > { %v246_v17 = vsel %vm143_vm3, 1.0, %v364_v9  ;;  %v244_v18 = vsel %vm141_vm4, 1.0, %v364_v9 }
  0x94   : > { %158 = vst [vmem:[%s110_s25 + $0x18] sm:$0xff] %v246_v17 }
  0x95   : > { %156 = vst [vmem:[%s110_s25 + $0x8] sm:$0xff] %v244_v18 }
  0x96   : > { %326 = shalt.err (!%p323_p3)
}
  0x97   : > { %s365_s19 = smov 128   ;;  %s366_s20 = smov 8  }
  0x98   : > { %253 = dma.vmem_to_hbm [thread:$0]  (%p415_p5), %s174_s30, 640, %s176_s2, %s161_s3, %s365_s19, %s365_s19, %s366_s20  }
  0x99 PF: > { %p259_p4 = scmp.ge.s32.totalorder %s361_s9, 2  ;;  %s190_s21 = sand.u32 1, %s349_s6  }
  0x9a   : > { %s191_s22 = scalar_lea.sflag [#allocation3], %s190_s21 }
  0x9b   : > { %p256_p7 = pnand %p259_p4, %p419_p6 }
  0x9d   : > { %p257_p8 = pneg %p256_p7 }
  0x9f   : > { %344 = dma.done.wait (%p257_p8), %s191_s22, 640  }
  0xa0   : > { %346 = vsyncadd (%p257_p8), %s191_s22, 4294966656  ;;  %p11_p9 = scmp.ge.s32.totalorder %s402_s12, 4   ;;  %s469_s6 = smov %s353_s7 }
  0xa1   : > { %s470_s7 = smov %s357_s8  ;;  %s471_s8 = smov %s413_s15 }
  0xa2   : > { %s472_s9 = smov %s402_s12  ;;  %13 = sbr.rel (!%p11_p9) target bundleno = 3 (0x3), region = 59 }
  0xa7   :  { %197 = vsyncpa [#allocation3], 1 }
  0xa8   :  { %199 = vsyncpa [#allocation3 + $0x1], 1 }

</bundles_post_ra>
